<compile_context>
chip_gen: v6e
topology: v6e:2x2x1
jax: 0.10.0
libtpu: 0.0.40
codegen_flags: <defaults>
</compile_context>

<pallas_src>
import functools

import jax
import jax.numpy as jnp
from jax.experimental import pallas as pl
from jax.experimental.pallas import tpu as pltpu


# ----------------------------------------------------------------------------
# Kernels
# ----------------------------------------------------------------------------
def _pass1_kernel(patches_ref, w_ref, b_ref, gamma_ref, beta_ref,
                  y_ref, scale_ref, shift_ref,
                  sum_acc, sq_acc, *, m_total, m_padded, tm):
    """Conv (MXU matmul) + bias + LeakyReLU per M-tile; accumulate BN stats."""
    i = pl.program_id(0)

    @pl.when(i == 0)
    def _():
        sum_acc[...] = jnp.zeros_like(sum_acc)
        sq_acc[...] = jnp.zeros_like(sq_acc)

    # bf16 operands, f32 accumulation on the MXU.
    y = jnp.dot(patches_ref[...], w_ref[...],
                preferred_element_type=jnp.float32)
    y = y + b_ref[...]
    y = jnp.where(y > 0.0, y, 0.2 * y)          # LeakyReLU(0.2)
    # Dropout2d(0.25): identity (eval mode).
    y_ref[...] = y

    # BatchNorm statistics; exclude zero-padded rows of the last tile.
    if m_padded != m_total:
        row = i * tm + jax.lax.broadcasted_iota(jnp.int32, (tm, 1), 0)
        y = jnp.where(row < m_total, y, 0.0)
    sum_acc[...] += jnp.sum(y, axis=0, keepdims=True)
    sq_acc[...] += jnp.sum(y * y, axis=0, keepdims=True)

    @pl.when(i == pl.num_programs(0) - 1)
    def _():
        inv_m = 1.0 / m_total
        mean = sum_acc[...] * inv_m
        var = jnp.maximum(sq_acc[...] * inv_m - mean * mean, 0.0)
        inv_std = jax.lax.rsqrt(var + 1e-5)
        scale = gamma_ref[...] * inv_std
        scale_ref[...] = scale
        shift_ref[...] = beta_ref[...] - mean * scale


def _pass2_kernel(y_ref, scale_ref, shift_ref, out_ref):
    """Apply the folded per-channel affine: out = y*scale + shift."""
    out_ref[...] = y_ref[...] * scale_ref[...] + shift_ref[...]


def _conv_act_kernel(patches_ref, w_ref, b_ref, out_ref):
    """bool_bn=False path: conv + bias + LeakyReLU only."""
    y = jnp.dot(patches_ref[...], w_ref[...],
                preferred_element_type=jnp.float32)
    y = y + b_ref[...]
    out_ref[...] = jnp.where(y > 0.0, y, 0.2 * y)


# ----------------------------------------------------------------------------
# Wrapper
# ----------------------------------------------------------------------------
def _round_up(v, mult):
    return -(-v // mult) * mult


def _im2col_nchw(x, ho, wo):
    """x: [N, Cin, H, W] -> patches [N*Ho*Wo, Cin*3*3] (k=3, stride=2, pad=1)."""
    n, cin, _, _ = x.shape
    x_pad = jnp.pad(x, ((0, 0), (0, 0), (1, 1), (1, 1)))
    cols = []
    for kh in range(3):
        for kw in range(3):
            cols.append(x_pad[:, :, kh:kh + 2 * ho - 1:2, kw:kw + 2 * wo - 1:2])
    p = jnp.stack(cols, axis=0)                 # [9, N, Cin, Ho, Wo]
    p = jnp.transpose(p, (1, 3, 4, 2, 0))       # [N, Ho, Wo, Cin, 9]
    return p.reshape(n * ho * wo, cin * 9)      # [M, K] (row-major)


@functools.partial(jax.jit, static_argnames=("bool_bn",))
def block_forward(x, conv_w, conv_b, gamma, beta, bool_bn=True):
    """x: [N, Cin, H, W] f32 (NCHW) -> [N, Cout, Ho, Wo] f32 (NCHW)."""
    n, cin, h, w = x.shape
    cout = conv_w.shape[0]
    ho = (h + 2 - 3) // 2 + 1
    wo = (w + 2 - 3) // 2 + 1
    m = n * ho * wo
    k = cin * 9

    # Lane / MXU friendly padded sizes.
    kp = _round_up(k, 8)                 # K (lanes of patches / sublanes of W)
    cp = _round_up(cout, 128)            # lane-dense output channels
    tm = _round_up(m, 16) if m <= 2048 else 1024
    mp = _round_up(m, tm)
    grid_m = mp // tm

    # im2col in bf16 (MXU operands), zero-pad M and K.
    # TODO(synk): fuse patch extraction into the kernel (memory_space=pl.ANY +
    # 9 shifted matmuls) to remove the im2col HBM blow-up entirely.
    patches = _im2col_nchw(x.astype(jnp.bfloat16), ho, wo)          # [M, K]
    patches = jnp.pad(patches, ((0, mp - m), (0, kp - k)))

    w_mat = conv_w.reshape(cout, k).T.astype(jnp.bfloat16)          # [K, Cout]
    w_mat = jnp.pad(w_mat, ((0, kp - k), (0, cp - cout)))
    b_row = jnp.pad(conv_b.astype(jnp.float32).reshape(1, cout),
                    ((0, 0), (0, cp - cout)))

    row_spec = pl.BlockSpec((1, cp), lambda i: (0, 0))
    w_spec = pl.BlockSpec((kp, cp), lambda i: (0, 0))
    patch_spec = pl.BlockSpec((tm, kp), lambda i: (i, 0))
    tile_spec = pl.BlockSpec((tm, cp), lambda i: (i, 0))

    if bool_bn:
        g_row = jnp.pad(gamma.astype(jnp.float32).reshape(1, cout),
                        ((0, 0), (0, cp - cout)))
        be_row = jnp.pad(beta.astype(jnp.float32).reshape(1, cout),
                         ((0, 0), (0, cp - cout)))

        # Pass 1: conv + bias + LeakyReLU, accumulate BN stats -> scale/shift.
        y_full, scale, shift = pl.pallas_call(
            functools.partial(_pass1_kernel, m_total=m, m_padded=mp, tm=tm),
            out_shape=(jax.ShapeDtypeStruct((mp, cp), jnp.float32),
                       jax.ShapeDtypeStruct((1, cp), jnp.float32),
                       jax.ShapeDtypeStruct((1, cp), jnp.float32)),
            grid=(grid_m,),
            in_specs=[patch_spec, w_spec, row_spec, row_spec, row_spec],
            out_specs=(tile_spec, row_spec, row_spec),
            scratch_shapes=[pltpu.VMEM((1, cp), jnp.float32),
                            pltpu.VMEM((1, cp), jnp.float32)],
            compiler_params=pltpu.CompilerParams(
                dimension_semantics=("arbitrary",)),
        )(patches, w_mat, b_row, g_row, be_row)

        # Pass 2: per-channel FMA, parallel over M tiles.
        y_out = pl.pallas_call(
            _pass2_kernel,
            out_shape=jax.ShapeDtypeStruct((mp, cp), jnp.float32),
            grid=(grid_m,),
            in_specs=[tile_spec, row_spec, row_spec],
            out_specs=tile_spec,
            compiler_params=pltpu.CompilerParams(
                dimension_semantics=("parallel",)),
        )(y_full, scale, shift)
    else:
        y_out = pl.pallas_call(
            _conv_act_kernel,
            out_shape=jax.ShapeDtypeStruct((mp, cp), jnp.float32),
            grid=(grid_m,),
            in_specs=[patch_spec, w_spec, row_spec],
            out_specs=tile_spec,
            compiler_params=pltpu.CompilerParams(
                dimension_semantics=("parallel",)),
        )(patches, w_mat, b_row)

    # [Mp, Cp] -> [N, Ho, Wo, Cout] -> NCHW (kept to match the PyTorch module;
    # NHWC is the natural kernel layout if the consumer can take it).
    y = y_out[:m, :cout].reshape(n, ho, wo, cout)
    return jnp.transpose(y, (0, 3, 1, 2))


# ----------------------------------------------------------------------------
# Reference & self-test
# ----------------------------------------------------------------------------
def _reference(x, conv_w, conv_b, gamma, beta, bool_bn=True):
    """Pure-JAX reference.  The conv is fed the same bf16-cast operands the
    kernel uses (f32 accumulation), so only accumulation-order noise remains
    vs. the Pallas path; the rest of the math is f32."""
    y = jax.lax.conv_general_dilated(
        x.astype(jnp.bfloat16), conv_w.astype(jnp.bfloat16),
        window_strides=(2, 2), padding=((1, 1), (1, 1)),
        dimension_numbers=("NCHW", "OIHW", "NCHW"),
        preferred_element_type=jnp.float32)
    y = y + conv_b[None, :, None, None]
    y = jnp.where(y > 0.0, y, 0.2 * y)
    if bool_bn:
        mean = jnp.mean(y, axis=(0, 2, 3), keepdims=True)
        var = jnp.mean((y - mean) ** 2, axis=(0, 2, 3), keepdims=True)
        y = (y - mean) * jax.lax.rsqrt(var + 1e-5)
        y = y * gamma[None, :, None, None] + beta[None, :, None, None]
    return y


if __name__ == "__main__":
    key = jax.random.PRNGKey(0)
    k_x, k_w, k_b, k_g, k_be = jax.random.split(key, 5)

    N, CIN, COUT, H, W = 2, 4, 8, 16, 16

    x = jax.random.normal(k_x, (N, CIN, H, W), jnp.float32)
    fan_in = CIN * 9
    bound = 1.0 / (fan_in ** 0.5)
    conv_w = jax.random.uniform(k_w, (COUT, CIN, 3, 3), jnp.float32,
                                minval=-bound, maxval=bound)
    conv_b = jax.random.uniform(k_b, (COUT,), jnp.float32,
                                minval=-bound, maxval=bound)
    gamma = 1.0 + 0.1 * jax.random.normal(k_g, (COUT,), jnp.float32)
    beta = 0.1 * jax.random.normal(k_be, (COUT,), jnp.float32)

    # bool_bn=True path (conv + leakyrelu + batchnorm, train-mode stats).
    out = block_forward(x, conv_w, conv_b, gamma, beta, bool_bn=True)
    out = jax.block_until_ready(out)
    ref = _reference(x, conv_w, conv_b, gamma, beta, bool_bn=True)
    assert out.shape == (N, COUT, H // 2, W // 2), out.shape
    assert jnp.allclose(out, ref, rtol=1e-3, atol=1e-3), (
        float(jnp.max(jnp.abs(out - ref))))

    # bool_bn=False path (conv + leakyrelu only).
    out_nb = block_forward(x, conv_w, conv_b, gamma, beta, bool_bn=False)
    out_nb = jax.block_until_ready(out_nb)
    ref_nb = _reference(x, conv_w, conv_b, gamma, beta, bool_bn=False)
    assert jnp.allclose(out_nb, ref_nb, rtol=1e-3, atol=1e-3), (
        float(jnp.max(jnp.abs(out_nb - ref_nb))))

    print("KERNEL_OK")
</pallas_src>

<mosaic_0001>
module attributes {stable_mosaic.version = 11 : i64} {
  func.func @_pass2_kernel(%arg0: i32, %arg1: memref<128x128xf32, #tpu.memory_space<vmem>>, %arg2: memref<1x128xf32, #tpu.memory_space<vmem>>, %arg3: memref<1x128xf32, #tpu.memory_space<vmem>>, %arg4: memref<128x128xf32, #tpu.memory_space<vmem>>) attributes {dimension_semantics = [#tpu.dimension_semantics<parallel>], iteration_bounds = array<i64: 1>, scalar_prefetch = 0 : i64, scratch_operands = 0 : i64, tpu.core_type = #tpu.core_type<tc>, window_params = [{transform_indices = @transform_0, window_bounds = array<i64: 128, 128>}, {pipeline_mode = #tpu.pipeline_mode<synchronous>, transform_indices = @transform_1, window_bounds = array<i64: 1, 128>}, {pipeline_mode = #tpu.pipeline_mode<synchronous>, transform_indices = @transform_2, window_bounds = array<i64: 1, 128>}, {transform_indices = @transform_3, window_bounds = array<i64: 128, 128>}]} {
    %c0 = arith.constant 0 : index
    %c0_0 = arith.constant 0 : index
    %0 = vector.load %arg1[%c0, %c0_0] : memref<128x128xf32, #tpu.memory_space<vmem>>, vector<128x128xf32>
    %c0_1 = arith.constant 0 : index
    %c0_2 = arith.constant 0 : index
    %1 = vector.load %arg2[%c0_1, %c0_2] : memref<1x128xf32, #tpu.memory_space<vmem>>, vector<1x128xf32>
    %2 = vector.broadcast %1 : vector<1x128xf32> to vector<128x128xf32>
    %3 = arith.mulf %0, %2 : vector<128x128xf32>
    %c0_3 = arith.constant 0 : index
    %c0_4 = arith.constant 0 : index
    %4 = vector.load %arg3[%c0_3, %c0_4] : memref<1x128xf32, #tpu.memory_space<vmem>>, vector<1x128xf32>
    %5 = vector.broadcast %4 : vector<1x128xf32> to vector<128x128xf32>
    %6 = arith.addf %3, %5 : vector<128x128xf32>
    %c0_5 = arith.constant 0 : index
    %c0_6 = arith.constant 0 : index
    %7 = vector.load %arg4[%c0_5, %c0_6] : memref<128x128xf32, #tpu.memory_space<vmem>>, vector<128x128xf32>
    tpu.vector_store %arg4[%c0_5, %c0_6], %6 {strides = array<i32>} : memref<128x128xf32, #tpu.memory_space<vmem>>, vector<128x128xf32>,
    return
  }
  func.func @transform_0(%arg0: i32) -> (i32, i32) {
    %c0_i32 = arith.constant 0 : i32
    %c0_i32_0 = arith.constant 0 : i32
    return %arg0, %c0_i32 : i32, i32
  }
  func.func @transform_1(%arg0: i32) -> (i32, i32) {
    %c0_i32 = arith.constant 0 : i32
    %c0_i32_0 = arith.constant 0 : i32
    %c0_i32_1 = arith.constant 0 : i32
    return %c0_i32, %c0_i32_0 : i32, i32
  }
  func.func @transform_2(%arg0: i32) -> (i32, i32) {
    %c0_i32 = arith.constant 0 : i32
    %c0_i32_0 = arith.constant 0 : i32
    %c0_i32_1 = arith.constant 0 : i32
    return %c0_i32, %c0_i32_0 : i32, i32
  }
  func.func @transform_3(%arg0: i32) -> (i32, i32) {
    %c0_i32 = arith.constant 0 : i32
    %c0_i32_0 = arith.constant 0 : i32
    return %arg0, %c0_i32 : i32, i32
  }
}

module attributes {stable_mosaic.version = 11 : i64} {
  func.func @_pass1_kernel(%arg0: i32, %arg1: memref<128x40xbf16, #tpu.memory_space<vmem>>, %arg2: memref<40x128xbf16, #tpu.memory_space<vmem>>, %arg3: memref<1x128xf32, #tpu.memory_space<vmem>>, %arg4: memref<1x128xf32, #tpu.memory_space<vmem>>, %arg5: memref<1x128xf32, #tpu.memory_space<vmem>>, %arg6: memref<128x128xf32, #tpu.memory_space<vmem>>, %arg7: memref<1x128xf32, #tpu.memory_space<vmem>>, %arg8: memref<1x128xf32, #tpu.memory_space<vmem>>, %arg9: memref<1x128xf32, #tpu.memory_space<vmem>>, %arg10: memref<1x128xf32, #tpu.memory_space<vmem>>) attributes {dimension_semantics = [#tpu.dimension_semantics<arbitrary>], iteration_bounds = array<i64: 1>, scalar_prefetch = 0 : i64, scratch_operands = 2 : i64, tpu.core_type = #tpu.core_type<tc>, window_params = [{transform_indices = @transform_0, window_bounds = array<i64: 128, 40>}, {pipeline_mode = #tpu.pipeline_mode<synchronous>, transform_indices = @transform_1, window_bounds = array<i64: 40, 128>}, {pipeline_mode = #tpu.pipeline_mode<synchronous>, transform_indices = @transform_2, window_bounds = array<i64: 1, 128>}, {pipeline_mode = #tpu.pipeline_mode<synchronous>, transform_indices = @transform_3, window_bounds = array<i64: 1, 128>}, {pipeline_mode = #tpu.pipeline_mode<synchronous>, transform_indices = @transform_4, window_bounds = array<i64: 1, 128>}, {transform_indices = @transform_5, window_bounds = array<i64: 128, 128>}, {pipeline_mode = #tpu.pipeline_mode<synchronous>, transform_indices = @transform_6, window_bounds = array<i64: 1, 128>}, {pipeline_mode = #tpu.pipeline_mode<synchronous>, transform_indices = @transform_7, window_bounds = array<i64: 1, 128>}]} {
    %c0_i32 = arith.constant 0 : i32
    %0 = arith.cmpi eq, %arg0, %c0_i32 : i32
    %1 = arith.extui %0 : i1 to i32
    %c0_i32_0 = arith.constant 0 : i32
    %2 = arith.cmpi ne, %1, %c0_i32_0 : i32
    scf.if %2 {
      %cst_22 = arith.constant 0.000000e+00 : f32
      %29 = vector.broadcast %cst_22 : f32 to vector<1x128xf32>
      %c0_23 = arith.constant 0 : index
      %c0_24 = arith.constant 0 : index
      %30 = vector.load %arg9[%c0_23, %c0_24] : memref<1x128xf32, #tpu.memory_space<vmem>>, vector<1x128xf32>
      tpu.vector_store %arg9[%c0_23, %c0_24], %29 {strides = array<i32>} : memref<1x128xf32, #tpu.memory_space<vmem>>, vector<1x128xf32>,
      %cst_25 = arith.constant 0.000000e+00 : f32
      %31 = vector.broadcast %cst_25 : f32 to vector<1x128xf32>
      %c0_26 = arith.constant 0 : index
      %c0_27 = arith.constant 0 : index
      %32 = vector.load %arg10[%c0_26, %c0_27] : memref<1x128xf32, #tpu.memory_space<vmem>>, vector<1x128xf32>
      tpu.vector_store %arg10[%c0_26, %c0_27], %31 {strides = array<i32>} : memref<1x128xf32, #tpu.memory_space<vmem>>, vector<1x128xf32>,
    } else {
    }
    %c0 = arith.constant 0 : index
    %c0_1 = arith.constant 0 : index
    %3 = vector.load %arg1[%c0, %c0_1] : memref<128x40xbf16, #tpu.memory_space<vmem>>, vector<128x40xbf16>
    %c0_2 = arith.constant 0 : index
    %c0_3 = arith.constant 0 : index
    %4 = vector.load %arg2[%c0_2, %c0_3] : memref<40x128xbf16, #tpu.memory_space<vmem>>, vector<40x128xbf16>
    %cst = arith.constant dense<0.000000e+00> : vector<128x128xf32>
    %5 = tpu.matmul %3, %4, %cst {dimension_numbers = #tpu.dot_dimension_numbers<[1], [0], [0], [1], [0, 0, 1, 1], [], []>} : vector<128x40xbf16>, vector<40x128xbf16>, vector<128x128xf32> -> vector<128x128xf32>
    %c0_4 = arith.constant 0 : index
    %c0_5 = arith.constant 0 : index
    %6 = vector.load %arg3[%c0_4, %c0_5] : memref<1x128xf32, #tpu.memory_space<vmem>>, vector<1x128xf32>
    %7 = vector.broadcast %6 : vector<1x128xf32> to vector<128x128xf32>
    %8 = arith.addf %5, %7 : vector<128x128xf32>
    %cst_6 = arith.constant 0.000000e+00 : f32
    %9 = vector.broadcast %cst_6 : f32 to vector<128x128xf32>
    %10 = arith.cmpf ogt, %8, %9 : vector<128x128xf32>
    %cst_7 = arith.constant 2.000000e-01 : f32
    %11 = vector.broadcast %cst_7 : f32 to vector<128x128xf32>
    %12 = arith.mulf %11, %8 : vector<128x128xf32>
    %13 = arith.select %10, %8, %12 : vector<128x128xi1>, vector<128x128xf32>
    %c0_8 = arith.constant 0 : index
    %c0_9 = arith.constant 0 : index
    %14 = vector.load %arg6[%c0_8, %c0_9] : memref<128x128xf32, #tpu.memory_space<vmem>>, vector<128x128xf32>
    tpu.vector_store %arg6[%c0_8, %c0_9], %13 {strides = array<i32>} : memref<128x128xf32, #tpu.memory_space<vmem>>, vector<128x128xf32>,
    %c0_10 = arith.constant 0 : index
    %c0_11 = arith.constant 0 : index
    %15 = vector.load %arg9[%c0_10, %c0_11] : memref<1x128xf32, #tpu.memory_space<vmem>>, vector<1x128xf32>
    %cst_12 = arith.constant dense<0.000000e+00> : vector<128xf32>
    %16 = vector.multi_reduction <add>, %13, %cst_12 [0] : vector<128x128xf32> to vector<128xf32>
    %17 = vector.shape_cast %16 : vector<128xf32> to vector<1x128xf32>
    %18 = arith.addf %15, %17 : vector<1x128xf32>
    %c0_13 = arith.constant 0 : index
    %c0_14 = arith.constant 0 : index
    %19 = vector.load %arg9[%c0_13, %c0_14] : memref<1x128xf32, #tpu.memory_space<vmem>>, vector<1x128xf32>
    tpu.vector_store %arg9[%c0_13, %c0_14], %18 {strides = array<i32>} : memref<1x128xf32, #tpu.memory_space<vmem>>, vector<1x128xf32>,
    %c0_15 = arith.constant 0 : index
    %c0_16 = arith.constant 0 : index
    %20 = vector.load %arg10[%c0_15, %c0_16] : memref<1x128xf32, #tpu.memory_space<vmem>>, vector<1x128xf32>
    %21 = arith.mulf %13, %13 : vector<128x128xf32>
    %cst_17 = arith.constant dense<0.000000e+00> : vector<128xf32>
    %22 = vector.multi_reduction <add>, %21, %cst_17 [0] : vector<128x128xf32> to vector<128xf32>
    %23 = vector.shape_cast %22 : vector<128xf32> to vector<1x128xf32>
    %24 = arith.addf %20, %23 : vector<1x128xf32>
    %c0_18 = arith.constant 0 : index
    %c0_19 = arith.constant 0 : index
    %25 = vector.load %arg10[%c0_18, %c0_19] : memref<1x128xf32, #tpu.memory_space<vmem>>, vector<1x128xf32>
    tpu.vector_store %arg10[%c0_18, %c0_19], %24 {strides = array<i32>} : memref<1x128xf32, #tpu.memory_space<vmem>>, vector<1x128xf32>,
    %c0_i32_20 = arith.constant 0 : i32
    %26 = arith.cmpi eq, %arg0, %c0_i32_20 : i32
    %27 = arith.extui %26 : i1 to i32
    %c0_i32_21 = arith.constant 0 : i32
    %28 = arith.cmpi ne, %27, %c0_i32_21 : i32
    scf.if %28 {
      %c0_22 = arith.constant 0 : index
      %c0_23 = arith.constant 0 : index
      %29 = vector.load %arg9[%c0_22, %c0_23] : memref<1x128xf32, #tpu.memory_space<vmem>>, vector<1x128xf32>
      %cst_24 = arith.constant 7.812500e-03 : f32
      %30 = vector.broadcast %cst_24 : f32 to vector<1x128xf32>
      %31 = arith.mulf %29, %30 : vector<1x128xf32>
      %c0_25 = arith.constant 0 : index
      %c0_26 = arith.constant 0 : index
      %32 = vector.load %arg10[%c0_25, %c0_26] : memref<1x128xf32, #tpu.memory_space<vmem>>, vector<1x128xf32>
      %cst_27 = arith.constant 7.812500e-03 : f32
      %33 = vector.broadcast %cst_27 : f32 to vector<1x128xf32>
      %34 = arith.mulf %32, %33 : vector<1x128xf32>
      %35 = arith.mulf %31, %31 : vector<1x128xf32>
      %36 = arith.subf %34, %35 : vector<1x128xf32>
      %cst_28 = arith.constant 0.000000e+00 : f32
      %37 = vector.broadcast %cst_28 : f32 to vector<1x128xf32>
      %38 = arith.maximumf %36, %37 : vector<1x128xf32>
      %cst_29 = arith.constant 9.99999974E-6 : f32
      %39 = vector.broadcast %cst_29 : f32 to vector<1x128xf32>
      %40 = arith.addf %38, %39 : vector<1x128xf32>
      %41 = math.rsqrt %40 : vector<1x128xf32>
      %c0_30 = arith.constant 0 : index
      %c0_31 = arith.constant 0 : index
      %42 = vector.load %arg4[%c0_30, %c0_31] : memref<1x128xf32, #tpu.memory_space<vmem>>, vector<1x128xf32>
      %43 = arith.mulf %42, %41 : vector<1x128xf32>
      %c0_32 = arith.constant 0 : index
      %c0_33 = arith.constant 0 : index
      %44 = vector.load %arg7[%c0_32, %c0_33] : memref<1x128xf32, #tpu.memory_space<vmem>>, vector<1x128xf32>
      tpu.vector_store %arg7[%c0_32, %c0_33], %43 {strides = array<i32>} : memref<1x128xf32, #tpu.memory_space<vmem>>, vector<1x128xf32>,
      %c0_34 = arith.constant 0 : index
      %c0_35 = arith.constant 0 : index
      %45 = vector.load %arg5[%c0_34, %c0_35] : memref<1x128xf32, #tpu.memory_space<vmem>>, vector<1x128xf32>
      %46 = arith.mulf %31, %43 : vector<1x128xf32>
      %47 = arith.subf %45, %46 : vector<1x128xf32>
      %c0_36 = arith.constant 0 : index
      %c0_37 = arith.constant 0 : index
      %48 = vector.load %arg8[%c0_36, %c0_37] : memref<1x128xf32, #tpu.memory_space<vmem>>, vector<1x128xf32>
      tpu.vector_store %arg8[%c0_36, %c0_37], %47 {strides = array<i32>} : memref<1x128xf32, #tpu.memory_space<vmem>>, vector<1x128xf32>,
    } else {
    }
    return
  }
  func.func @transform_0(%arg0: i32) -> (i32, i32) {
    %c0_i32 = arith.constant 0 : i32
    %c0_i32_0 = arith.constant 0 : i32
    return %arg0, %c0_i32 : i32, i32
  }
  func.func @transform_1(%arg0: i32) -> (i32, i32) {
    %c0_i32 = arith.constant 0 : i32
    %c0_i32_0 = arith.constant 0 : i32
    %c0_i32_1 = arith.constant 0 : i32
    return %c0_i32, %c0_i32_0 : i32, i32
  }
  func.func @transform_2(%arg0: i32) -> (i32, i32) {
    %c0_i32 = arith.constant 0 : i32
    %c0_i32_0 = arith.constant 0 : i32
    %c0_i32_1 = arith.constant 0 : i32
    return %c0_i32, %c0_i32_0 : i32, i32
  }
  func.func @transform_3(%arg0: i32) -> (i32, i32) {
    %c0_i32 = arith.constant 0 : i32
    %c0_i32_0 = arith.constant 0 : i32
    %c0_i32_1 = arith.constant 0 : i32
    return %c0_i32, %c0_i32_0 : i32, i32
  }
  func.func @transform_4(%arg0: i32) -> (i32, i32) {
    %c0_i32 = arith.constant 0 : i32
    %c0_i32_0 = arith.constant 0 : i32
    %c0_i32_1 = arith.constant 0 : i32
    return %c0_i32, %c0_i32_0 : i32, i32
  }
  func.func @transform_5(%arg0: i32) -> (i32, i32) {
    %c0_i32 = arith.constant 0 : i32
    %c0_i32_0 = arith.constant 0 : i32
    return %arg0, %c0_i32 : i32, i32
  }
  func.func @transform_6(%arg0: i32) -> (i32, i32) {
    %c0_i32 = arith.constant 0 : i32
    %c0_i32_0 = arith.constant 0 : i32
    %c0_i32_1 = arith.constant 0 : i32
    return %c0_i32, %c0_i32_0 : i32, i32
  }
  func.func @transform_7(%arg0: i32) -> (i32, i32) {
    %c0_i32 = arith.constant 0 : i32
    %c0_i32_0 = arith.constant 0 : i32
    %c0_i32_1 = arith.constant 0 : i32
    return %c0_i32, %c0_i32_0 : i32, i32
  }
}

</mosaic_0001>

<bundles_post_ra>
// kernel: block_forward.3
= control target key start
LH: loop header
LB: loop body
LE: loop exit
PB: predicated region body
PF: predicated region fallthrough
CT: control target
= control target key end

     0   :  { %s220_s0 = inlined_call_operand.vmem [shape: f32[128,128], index: 0, kind: input, shape index: {}]   ;;  %s221_s1 = inlined_call_operand.vmem [shape: f32[1,128], index: 1, kind: input, shape index: {}]   ;;  %s222_s2 = inlined_call_operand.vmem [shape: f32[1,128], index: 2, kind: input, shape index: {}]   ;;  %s223_s3 = inlined_call_operand.vmem [shape: f32[128,128], index: 3, kind: output, shape index: {}]  }
   0x1   :  { %v14_v0 = vld [vmem:[%s220_s0] sm:$0xff]  ;;  %v15_v4 = vld [vmem:[%s220_s0 + $0x8] sm:$0xff]  ;;  %v16_v5 = vld [vmem:[%s220_s0 + $0x10] sm:$0xff] }
   0x2   :  { %v96_v1 = vld [vmem:[%s221_s1] ss:$0 sm:$0xff]  ;;  %v17_v6 = vld [vmem:[%s220_s0 + $0x18] sm:$0xff]  ;;  %v19_v11 = vld [vmem:[%s220_s0 + $0x28] sm:$0xff] }
   0x3   :  { %v97_v2 = vld [vmem:[%s222_s2] ss:$0 sm:$0xff]  ;;  %v37_v3 = vmul.f32 %v96_v1, %v14_v0  ;;  %v38_v7 = vmul.f32 %v96_v1, %v15_v4  ;;  %v39_v8 = vmul.f32 %v96_v1, %v16_v5  ;;  %v40_v9 = vmul.f32 %v96_v1, %v17_v6  ;;  %v20_v12 = vld [vmem:[%s220_s0 + $0x30] sm:$0xff]  ;;  %v21_v17 = vld [vmem:[%s220_s0 + $0x38] sm:$0xff] }
   0x4   :  { %v18_v10 = vld [vmem:[%s220_s0 + $0x20] sm:$0xff]  ;;  %v42_v15 = vmul.f32 %v96_v1, %v19_v11  ;;  %v43_v16 = vmul.f32 %v96_v1, %v20_v12  ;;  %v23_v19 = vld [vmem:[%s220_s0 + $0x48] sm:$0xff]  ;;  %v44_v23 = vmul.f32 %v96_v1, %v21_v17  ;;  %v24_v24 = vld [vmem:[%s220_s0 + $0x50] sm:$0xff] }
   0x5   :  { %v60_v13 = vadd.f32 %v97_v2, %v37_v3  ;;  %v41_v14 = vmul.f32 %v96_v1, %v18_v10  ;;  %v22_v18 = vld [vmem:[%s220_s0 + $0x40] sm:$0xff]  ;;  %v61_v20 = vadd.f32 %v97_v2, %v38_v7  ;;  %v62_v21 = vadd.f32 %v97_v2, %v39_v8  ;;  %v25_v25 = vld [vmem:[%s220_s0 + $0x58] sm:$0xff]  ;;  %v27_v31 = vld [vmem:[%s220_s0 + $0x68] sm:$0xff] }
   0x6   :  { %v63_v22 = vadd.f32 %v97_v2, %v40_v9  ;;  %v26_v26 = vld [vmem:[%s220_s0 + $0x60] sm:$0xff]  ;;  %v65_v28 = vadd.f32 %v97_v2, %v42_v15  ;;  %v66_v29 = vadd.f32 %v97_v2, %v43_v16  ;;  %v45_v30 = vmul.f32 %v96_v1, %v22_v18  ;;  %v28_v32 = vld [vmem:[%s220_s0 + $0x70] sm:$0xff]  ;;  %v29_v33 = vld [vmem:[%s220_s0 + $0x78] sm:$0xff] }
   0x7   :  { %76 = vst [vmem:[%s223_s3] sm:$0xff] %v60_v13  ;;  %v64_v27 = vadd.f32 %v97_v2, %v41_v14  ;;  %77 = vst [vmem:[%s223_s3 + $0x8] sm:$0xff] %v61_v20  ;;  %v67_v34 = vadd.f32 %v97_v2, %v44_v23  ;;  %v46_v35 = vmul.f32 %v96_v1, %v23_v19 }
   0x8   :  { %78 = vst [vmem:[%s223_s3 + $0x10] sm:$0xff] %v62_v21  ;;  %79 = vst [vmem:[%s223_s3 + $0x18] sm:$0xff] %v63_v22  ;;  %v47_v36 = vmul.f32 %v96_v1, %v24_v24  ;;  %v48_v37 = vmul.f32 %v96_v1, %v25_v25  ;;  %v68_v38 = vadd.f32 %v97_v2, %v45_v30 }
   0x9   :  { %80 = vst [vmem:[%s223_s3 + $0x20] sm:$0xff] %v64_v27  ;;  %81 = vst [vmem:[%s223_s3 + $0x28] sm:$0xff] %v65_v28  ;;  %v49_v39 = vmul.f32 %v96_v1, %v26_v26  ;;  %v50_v40 = vmul.f32 %v96_v1, %v27_v31  ;;  %v51_v41 = vmul.f32 %v96_v1, %v28_v32 }
   0xa   :  { %82 = vst [vmem:[%s223_s3 + $0x30] sm:$0xff] %v66_v29  ;;  %83 = vst [vmem:[%s223_s3 + $0x38] sm:$0xff] %v67_v34  ;;  %v69_v42 = vadd.f32 %v97_v2, %v46_v35  ;;  %v70_v43 = vadd.f32 %v97_v2, %v47_v36  ;;  %v71_v44 = vadd.f32 %v97_v2, %v48_v37 }
   0xb   :  { %v52_v45 = vmul.f32 %v96_v1, %v29_v33  ;;  %84 = vst [vmem:[%s223_s3 + $0x40] sm:$0xff] %v68_v38  ;;  %v72_v46 = vadd.f32 %v97_v2, %v49_v39  ;;  %v73_v47 = vadd.f32 %v97_v2, %v50_v40  ;;  %v74_v48 = vadd.f32 %v97_v2, %v51_v41 }
   0xc   :  { %85 = vst [vmem:[%s223_s3 + $0x48] sm:$0xff] %v69_v42  ;;  %86 = vst [vmem:[%s223_s3 + $0x50] sm:$0xff] %v70_v43 }
   0xd   :  { %87 = vst [vmem:[%s223_s3 + $0x58] sm:$0xff] %v71_v44  ;;  %v75_v49 = vadd.f32 %v97_v2, %v52_v45  ;;  %88 = vst [vmem:[%s223_s3 + $0x60] sm:$0xff] %v72_v46 }
   0xe   :  { %89 = vst [vmem:[%s223_s3 + $0x68] sm:$0xff] %v73_v47  ;;  %90 = vst [vmem:[%s223_s3 + $0x70] sm:$0xff] %v74_v48 }
   0xf   :  { %91 = vst [vmem:[%s223_s3 + $0x78] sm:$0xff] %v75_v49 }

// kernel: block_forward.2
= control target key start
LH: loop header
LB: loop body
LE: loop exit
PB: predicated region body
PF: predicated region fallthrough
CT: control target
= control target key end

     0   :  { %vm138_vm0 = vcmask 1043456   ;;  %vm113_vm1 = vcmask 326656   ;;  %v473_v12 = vmov 0.0   ;;  %s654_s1 = inlined_call_operand.vmem [shape: bf16[40,128], index: 1, kind: input, shape index: {}]   ;;  %s655_s0 = inlined_call_operand.vmem [shape: bf16[128,40], index: 0, kind: input, shape index: {}]   ;;  %s656_s2 = inlined_call_operand.vmem [shape: f32[1,128], index: 2, kind: input, shape index: {}]   ;;  %s657_s5 = inlined_call_operand.vmem [shape: f32[128,128], index: 5, kind: output, shape index: {0}]   ;;  %s658_s3 = inlined_call_operand.vmem [shape: f32[1,128], index: 3, kind: input, shape index: {}]   ;;  %s659_s4 = inlined_call_operand.vmem [shape: f32[1,128], index: 4, kind: input, shape index: {}]   ;;  %s660_s6 = inlined_call_operand.vmem [shape: f32[1,128], index: 6, kind: output, shape index: {1}]   ;;  %s661_s7 = inlined_call_operand.vmem [shape: f32[1,128], index: 7, kind: output, shape index: {2}]  }
   0x1   :  { %v460_v0 = vld [vmem:[%s654_s1 + $0x10] ss:$0 sps:$4 sm:$0xff]   ;;  %v461_v1 = vld [vmem:[%s654_s1 + $0x8] sm:$0xff]   ;;  %v463_v3 = vld [vmem:[%s655_s0] sm:$0xff]   ;;  %28 = vst [vmem:[#allocation2] sm:$0x1] %v473_v12 }
   0x2   :  { %457 = vmatprep.subr.msk.bf16.mxu0 %vm138_vm0, %v460_v0  ;;  %v140_v2 = vsel %vm138_vm0, %v460_v0, 0  ;;  %458 = vmatprep.subr.msk.bf16.mxu1 %vm138_vm0, %v460_v0  ;;  %v462_v4 = vld [vmem:[%s654_s1] sm:$0xff]   ;;  %v464_v6 = vld [vmem:[%s655_s0 + $0x8] sm:$0xff]   ;;  %v465_v8 = vld [vmem:[%s655_s0 + $0x10] sm:$0xff]   ;;  %29 = vst [vmem:[#allocation3] sm:$0x1] %v473_v12 }
   0x3   :  { %430 = vmatpush3.bf16.msra.mxu0 %v140_v2  ;;  %454 = vmatpush3.bf16.msra.mxu1 %v140_v2  ;;  %v466_v5 = vld [vmem:[%s655_s0 + $0x20] sm:$0xff]   ;;  %v468_v7 = vld [vmem:[%s655_s0 + $0x28] sm:$0xff]   ;;  %v469_v9 = vld [vmem:[%s655_s0 + $0x30] sm:$0xff]  }
   0x4   :  { %431 = vmatprep.subr.bf16.mxu0 %v461_v1  ;;  %452 = vmatprep.subr.bf16.mxu1 %v461_v1  ;;  %v467_v10 = vld [vmem:[%s655_s0 + $0x18] sm:$0xff]   ;;  %v558_v13 = vld [vmem:[%s656_s2] ss:$0 sm:$0xff] }
   0x5   :  { %435 = vmatprep.mubr.msk.bf16.mxu0 %vm113_vm1, %v463_v3  ;;  %443 = vmatprep.mubr.msk.bf16.mxu1 %vm113_vm1, %v466_v5  ;;  %v470_v11 = vld [vmem:[%s655_s0 + $0x38] sm:$0xff]  }
   0x7   :  { %432 = vmatpush3.bf16.msra.mxu0 %v461_v1  ;;  %455 = vmatpush3.bf16.msra.mxu1 %v461_v1 }
   0x8   :  { %433 = vmatprep.subr.bf16.mxu0 %v462_v4  ;;  %453 = vmatprep.subr.bf16.mxu1 %v462_v4 }
   0xb   :  { %434 = vmatpush3.bf16.msra.mxu0 %v462_v4  ;;  %456 = vmatpush3.bf16.msra.mxu1 %v462_v4 }
   0xe   :  { %436 = vmatmul.mubr.msk.bf16.vlgmr.msra.gmra.mxu0 %vm113_vm1, %v464_v6  ;;  %444 = vmatmul.mubr.msk.bf16.vlgmr.msra.gmra.mxu1 %vm113_vm1, %v468_v7 }
   0xf   :  { %439 = vmatprep.mubr.msk.bf16.mxu0 %vm113_vm1, %v465_v8  ;;  %447 = vmatprep.mubr.msk.bf16.mxu1 %vm113_vm1, %v469_v9 }
  0x16   :  { %440 = vmatmul.mubr.msk.bf16.gmra.mxu0 %vm113_vm1, %v467_v10  ;;  %448 = vmatmul.mubr.msk.bf16.gmra.mxu1 %vm113_vm1, %v470_v11 }
  0xce   :  { %v437_v14 = vpop.f32.mrf.mxu0  ;;  %v445_v15 = vpop.f32.mrf.mxu1 }
  0xcf   :  { %v185_v16 = vadd.f32 %v437_v14, %v558_v13  ;;  %v217_v17 = vadd.f32 %v445_v15, %v558_v13 }
  0xd0   :  { %v176_v18 = vpop.f32.mrf.mxu0  ;;  %v208_v19 = vpop.f32.mrf.mxu1 }
  0xd1   :  { %vm241_vm2 = vcmp.gt.f32.partialorder %v185_v16, 0.0  ;;  %v257_v20 = vmul.f32 0.2, %v185_v16  ;;  %v177_v21 = vadd.f32 %v558_v13, %v176_v18  ;;  %vm249_vm3 = vcmp.gt.f32.partialorder %v217_v17, 0.0 }
  0xd2   :  { %v438_v22 = vpop.f32.mrf.mxu0  ;;  %v265_v23 = vmul.f32 0.2, %v217_v17  ;;  %v209_v24 = vadd.f32 %v558_v13, %v208_v19  ;;  %v446_v25 = vpop.f32.mrf.mxu1 }
  0xd3   :  { %v273_v26 = vsel %vm241_vm2, %v185_v16, %v257_v20  ;;  %vm239_vm4 = vcmp.gt.f32.partialorder %v177_v21, 0.0  ;;  %v255_v27 = vmul.f32 0.2, %v177_v21  ;;  %v188_v28 = vadd.f32 %v438_v22, %v558_v13 }
  0xd4   :  { %289 = vst [vmem:[%s657_s5 + $0x10] sm:$0xff] %v273_v26  ;;  %v179_v29 = vpop.f32.mrf.mxu0  ;;  %v568_v30 = vsel %vm249_vm3, %v217_v17, %v265_v23  ;;  %vm247_vm5 = vcmp.gt.f32.partialorder %v209_v24, 0.0  ;;  %v263_v31 = vmul.f32 0.2, %v209_v24  ;;  %v211_v32 = vpop.f32.mrf.mxu1  ;;  %v220_v38 = vadd.f32 %v446_v25, %v558_v13 }
  0xd5   :  { %v271_v33 = vsel %vm239_vm4, %v177_v21, %v255_v27  ;;  %vm242_vm6 = vcmp.gt.f32.partialorder %v188_v28, 0.0  ;;  %v258_v34 = vmul.f32 0.2, %v188_v28  ;;  %v180_v35 = vadd.f32 %v558_v13, %v179_v29  ;;  %297 = vst [vmem:[%s657_s5 + $0x50] sm:$0xff] %v568_v30 }
  0xd6   :  { %287 = vst [vmem:[%s657_s5] sm:$0xff] %v271_v33  ;;  %v441_v36 = vpop.f32.mrf.mxu0  ;;  %v578_v37 = vsel %vm247_vm5, %v209_v24, %v263_v31  ;;  %v449_v39 = vpop.f32.mrf.mxu1  ;;  %v328_v43 = vmul.f32 %v271_v33, %v271_v33  ;;  %vm250_vm8 = vcmp.gt.f32.partialorder %v220_v38, 0.0  ;;  %v266_v45 = vmul.f32 0.2, %v220_v38 }
  0xd7   :  { %v274_v40 = vsel %vm242_vm6, %v188_v28, %v258_v34  ;;  %vm240_vm7 = vcmp.gt.f32.partialorder %v180_v35, 0.0  ;;  %v256_v41 = vmul.f32 0.2, %v180_v35  ;;  %v201_v42 = vadd.f32 %v441_v36, %v558_v13  ;;  %295 = vst [vmem:[%s657_s5 + $0x40] sm:$0xff] %v578_v37 }
  0xd8   :  { %290 = vst [vmem:[%s657_s5 + $0x18] sm:$0xff] %v274_v40  ;;  %v192_v44 = vpop.f32.mrf.mxu0  ;;  %v593_v52 = vsel %vm250_vm8, %v220_v38, %v266_v45  ;;  %v212_v53 = vadd.f32 %v558_v13, %v211_v32  ;;  %v224_v54 = vpop.f32.mrf.mxu1  ;;  %v330_v58 = vmul.f32 %v273_v26, %v273_v26  ;;  %v331_v1 = vmul.f32 %v274_v40, %v274_v40 }
  0xd9   :  { %v272_v46 = vsel %vm240_vm7, %v180_v35, %v256_v41  ;;  %vm245_vm9 = vcmp.gt.f32.partialorder %v201_v42, 0.0  ;;  %v261_v47 = vmul.f32 0.2, %v201_v42  ;;  %v193_v48 = vadd.f32 %v558_v13, %v192_v44  ;;  %298 = vst [vmem:[%s657_s5 + $0x58] sm:$0xff] %v593_v52 }
  0xda   :  { %288 = vst [vmem:[%s657_s5 + $0x8] sm:$0xff] %v272_v46  ;;  %v304_v49 = vadd.f32 %v272_v46, %v271_v33  ;;  %v329_v50 = vmul.f32 %v272_v46, %v272_v46  ;;  %v442_v51 = vpop.f32.mrf.mxu0  ;;  %vm248_vm12 = vcmp.gt.f32.partialorder %v212_v53, 0.0  ;;  %v450_v4 = vpop.f32.mrf.mxu1  ;;  %v264_v7 = vmul.f32 0.2, %v212_v53 }
  0xdb   :  { %v277_v55 = vsel %vm245_vm9, %v201_v42, %v261_v47  ;;  %vm243_vm10 = vcmp.gt.f32.partialorder %v193_v48, 0.0  ;;  %v259_v56 = vmul.f32 0.2, %v193_v48  ;;  %v204_v57 = vadd.f32 %v442_v51, %v558_v13 }
  0xdc   :  { %v305_v59 = vadd.f32 %v304_v49, %v273_v26  ;;  %v344_v60 = vadd.f32 %v329_v50, %v328_v43  ;;  %293 = vst [vmem:[%s657_s5 + $0x30] sm:$0xff] %v277_v55  ;;  %v195_v61 = vpop.f32.mrf.mxu0  ;;  %v233_v11 = vadd.f32 %v449_v39, %v558_v13  ;;  %v280_v14 = vsel %vm248_vm12, %v212_v53, %v264_v7  ;;  %v227_v21 = vpop.f32.mrf.mxu1 }
  0xdd   :  { %v275_v62 = vsel %vm243_vm10, %v193_v48, %v259_v56  ;;  %vm246_vm11 = vcmp.gt.f32.partialorder %v204_v57, 0.0  ;;  %v262_v63 = vmul.f32 0.2, %v204_v57  ;;  %v196_v0 = vadd.f32 %v558_v13, %v195_v61  ;;  %296 = vst [vmem:[%s657_s5 + $0x48] sm:$0xff] %v280_v14 }
  0xde   :  { %v345_v2 = vadd.f32 %v344_v60, %v330_v58  ;;  %291 = vst [vmem:[%s657_s5 + $0x20] sm:$0xff] %v275_v62  ;;  %v306_v3 = vadd.f32 %v305_v59, %v274_v40  ;;  %v332_v9 = vmul.f32 %v275_v62, %v275_v62  ;;  %v225_v15 = vadd.f32 %v558_v13, %v224_v54 }
  0xdf   :  { %v278_v5 = vsel %vm246_vm11, %v204_v57, %v262_v63  ;;  %vm244_vm13 = vcmp.gt.f32.partialorder %v196_v0, 0.0  ;;  %v260_v6 = vmul.f32 0.2, %v196_v0  ;;  %v236_v16 = vadd.f32 %v450_v4, %v558_v13 }
  0xe0   :  { %v307_v8 = vadd.f32 %v306_v3, %v275_v62  ;;  %v346_v10 = vadd.f32 %v345_v2, %v331_v1  ;;  %294 = vst [vmem:[%s657_s5 + $0x38] sm:$0xff] %v278_v5  ;;  %v334_v17 = vmul.f32 %v277_v55, %v277_v55  ;;  %vm253_vm14 = vcmp.gt.f32.partialorder %v233_v11, 0.0 }
  0xe1   :  { %v276_v12 = vsel %vm244_vm13, %v196_v0, %v260_v6  ;;  %v269_v22 = vmul.f32 0.2, %v233_v11  ;;  %vm251_vm15 = vcmp.gt.f32.partialorder %v225_v15, 0.0  ;;  %v267_v23 = vmul.f32 0.2, %v225_v15 }
  0xe2   :  { %v347_v18 = vadd.f32 %v346_v10, %v332_v9  ;;  %292 = vst [vmem:[%s657_s5 + $0x28] sm:$0xff] %v276_v12  ;;  %v308_v19 = vadd.f32 %v307_v8, %v276_v12  ;;  %v333_v20 = vmul.f32 %v276_v12, %v276_v12  ;;  %vm254_vm0 = vcmp.gt.f32.partialorder %v236_v16, 0.0  ;;  %v327_v8 = vld [vmem:[#allocation3] sm:$0x1] }
  0xe3   :  { %v270_v26 = vmul.f32 0.2, %v236_v16  ;;  %v285_v27 = vsel %vm253_vm14, %v233_v11, %v269_v22  ;;  %v283_v28 = vsel %vm251_vm15, %v225_v15, %v267_v23  ;;  %v228_v29 = vadd.f32 %v558_v13, %v227_v21  ;;  %v379_v21 = vld [vmem:[%s658_s3] sm:$0x1] }
  0xe4   :  { %v309_v24 = vadd.f32 %v308_v19, %v277_v55  ;;  %v348_v25 = vadd.f32 %v347_v18, %v333_v20  ;;  %v335_v31 = vmul.f32 %v278_v5, %v278_v5  ;;  %301 = vst [vmem:[%s657_s5 + $0x70] sm:$0xff] %v285_v27  ;;  %299 = vst [vmem:[%s657_s5 + $0x60] sm:$0xff] %v283_v28 }
  0xe5   :  { %v286_v34 = vsel %vm254_vm0, %v236_v16, %v270_v26  ;;  %vm252_vm1 = vcmp.gt.f32.partialorder %v228_v29, 0.0  ;;  %v268_v35 = vmul.f32 0.2, %v228_v29  ;;  %v336_v36 = vmul.f32 %v578_v37, %v578_v37 }
  0xe6   :  { %v349_v32 = vadd.f32 %v348_v25, %v334_v17  ;;  %v310_v33 = vadd.f32 %v309_v24, %v278_v5  ;;  %302 = vst [vmem:[%s657_s5 + $0x78] sm:$0xff] %v286_v34  ;;  %v337_v41 = vmul.f32 %v280_v14, %v280_v14  ;;  %v338_v43 = vmul.f32 %v568_v30, %v568_v30  ;;  %v303_v5 = vld [vmem:[#allocation2] sm:$0x1] }
  0xe7   :  { %v284_v39 = vsel %vm252_vm1, %v228_v29, %v268_v35  ;;  %v340_v49 = vmul.f32 %v283_v28, %v283_v28  ;;  %v342_v55 = vmul.f32 %v285_v27, %v285_v27  ;;  %v343_v58 = vmul.f32 %v286_v34, %v286_v34  ;;  %v382_v24 = vld [vmem:[%s659_s4] sm:$0x1] }
  0xe8   :  { %v311_v38 = vadd.f32 %v310_v33, %v578_v37  ;;  %v350_v13 = vadd.f32 %v349_v32, %v335_v31  ;;  %300 = vst [vmem:[%s657_s5 + $0x68] sm:$0xff] %v284_v39  ;;  %v339_v37 = vmul.f32 %v593_v52, %v593_v52  ;;  %v341_v54 = vmul.f32 %v284_v39, %v284_v39 }
  0xea   :  { %v312_v40 = vadd.f32 %v311_v38, %v280_v14  ;;  %v351_v42 = vadd.f32 %v350_v13, %v336_v36 }
  0xec   :  { %v313_v44 = vadd.f32 %v312_v40, %v568_v30  ;;  %v352_v45 = vadd.f32 %v351_v42, %v337_v41 }
  0xee   :  { %v353_v46 = vadd.f32 %v352_v45, %v338_v43  ;;  %v314_v47 = vadd.f32 %v313_v44, %v593_v52 }
  0xf0   :  { %v315_v48 = vadd.f32 %v314_v47, %v283_v28  ;;  %v354_v50 = vadd.f32 %v353_v46, %v339_v37 }
  0xf2   :  { %v355_v51 = vadd.f32 %v354_v50, %v340_v49  ;;  %v316_v53 = vadd.f32 %v315_v48, %v284_v39 }
  0xf4   :  { %v317_v56 = vadd.f32 %v316_v53, %v285_v27  ;;  %v356_v57 = vadd.f32 %v355_v51, %v341_v54 }
  0xf6   :  { %v318_v59 = vadd.f32 %v317_v56, %v286_v34  ;;  %v357_v60 = vadd.f32 %v356_v57, %v342_v55 }
  0xf8   :  { %v319_v30 = vrot.slane %v318_v59, 4  ;;  %v358_v61 = vadd.f32 %v357_v60, %v343_v58 }
  0xfa   :  { %v320_v62 = vadd.f32 %v319_v30, %v318_v59  ;;  %v359_v63 = vrot.slane %v358_v61, 4 }
  0xfc   :  { %v321_v0 = vrot.slane %v320_v62, 2  ;;  %v360_v1 = vadd.f32 %v359_v63, %v358_v61 }
  0xfe   :  { %v322_v2 = vadd.f32 %v321_v0, %v320_v62  ;;  %v361_v52 = vrot.slane %v360_v1, 2 }
 0x100   :  { %v323_v3 = vrot.slane %v322_v2, 1  ;;  %v362_v4 = vadd.f32 %v361_v52, %v360_v1 }
 0x102   :  { %v324_v6 = vadd.f32 %v323_v3, %v322_v2  ;;  %v363_v7 = vrot.slane %v362_v4, 1 }
 0x104   :  { %v325_v9 = vadd.f32 %v324_v6, %v303_v5  ;;  %v364_v10 = vadd.f32 %v363_v7, %v362_v4 }
 0x106   :  { %326 = vst [vmem:[#allocation2] sm:$0x1] %v325_v9  ;;  %v365_v11 = vadd.f32 %v364_v10, %v327_v8 }
 0x108   :  { %366 = vst [vmem:[#allocation3] sm:$0x1] %v365_v11 }
 0x10d   :  { %v370_v12 = vld [vmem:[#allocation2] sm:$0x1] }
 0x10e   :  { %v371_v14 = vmul.f32 0.0078125, %v370_v12 }
 0x10f   :  { %v372_v15 = vld [vmem:[#allocation3] sm:$0x1] }
 0x110   :  { %v373_v16 = vmul.f32 0.0078125, %v372_v15  ;;  %v374_v17 = vmul.f32 %v371_v14, %v371_v14 }
 0x112   :  { %v375_v18 = vsub.f32 %v373_v16, %v374_v17 }
 0x114   :  { %v376_v19 = vmax.f32 %v375_v18, 0.0 }
 0x116   :  { %v377_v20 = vadd.f32 1e-05, %v376_v19 }
 0x118   :  { %471 = vrsqrt.f32 %v377_v20 }
 0x125   :  { %v472_v22 = vpop.eup %471 }
 0x126   :  { %v380_v23 = vmul.f32 %v472_v22, %v379_v21 }
 0x128   :  { %381 = vst [vmem:[%s660_s6] sm:$0x1] %v380_v23  ;;  %v383_v25 = vmul.f32 %v380_v23, %v371_v14 }
 0x12a   :  { %v384_v26 = vsub.f32 %v382_v24, %v383_v25 }
 0x12c   :  { %385 = vst [vmem:[%s661_s7] sm:$0x1] %v384_v26 }

</bundles_post_ra>
